<compile_context>
chip_gen: v5e
topology: v5e:2x2
jax: 0.10.0
libtpu: 0.0.40
codegen_flags: <defaults>
</compile_context>

<pallas_src>
import math
from functools import partial

import jax
import jax.numpy as jnp
from jax.experimental import pallas as pl
from jax.experimental.pallas import tpu as pltpu

LN_EPS = 1e-5


# ------------------------- per-chip compiler params -------------------------

def _scoped_vmem_bytes():
    """Chip-aware scoped-VMEM budget (None -> keep compiler default)."""
    try:
        info = pltpu.get_tpu_info()
        cap = getattr(info, "vmem_capacity_bytes", None)
        if cap:
            # half of physical VMEM, capped at 64 MiB (v5e/v6e: 64 MiB, v7x: 32 MiB)
            return int(min(int(cap) // 2, 64 * 1024 * 1024))
    except Exception:
        pass
    return None


_SCOPED_VMEM = _scoped_vmem_bytes()


def _mosaic_params(*dims):
    if _SCOPED_VMEM is not None:
        return pltpu.CompilerParams(dimension_semantics=dims,
                                    vmem_limit_bytes=_SCOPED_VMEM)
    return pltpu.CompilerParams(dimension_semantics=dims)


# ============================== Pallas kernels ==============================

def _ln_qkv_kernel(x_ref, g_ref, b_ref, w_ref, bias_ref,
                   q_ref, k_ref, v_ref, *, eps, c):
    """Fused LayerNorm (f32 stats) + qkv Linear (bf16 MXU, f32 accumulate).
    The (tm, 3C) result is split into q/k/v in-kernel so no XLA slice/transpose
    of the 3C-wide tensor ever touches HBM."""
    x = x_ref[...]
    mean = jnp.mean(x, axis=-1, keepdims=True)
    var = jnp.mean(jnp.square(x - mean), axis=-1, keepdims=True)
    xn = (x - mean) * jax.lax.rsqrt(var + eps) * g_ref[...] + b_ref[...]
    y = jnp.dot(xn.astype(jnp.bfloat16), w_ref[...],
                preferred_element_type=jnp.float32) + bias_ref[...]
    q_ref[...] = y[:, :c].astype(q_ref.dtype)
    k_ref[...] = y[:, c:2 * c].astype(k_ref.dtype)
    v_ref[...] = y[:, 2 * c:].astype(v_ref.dtype)


def _ln_mlp_proj_kernel(x_ref, g_ref, b_ref, pw_ref, pb_ref,
                        w1_ref, b1_ref, w2_ref, b2_ref, o_ref, *, eps):
    """Fused norm2 + channel projection + MLP (fc1 -> exact GELU -> fc2).
    The (tm, 4C) hidden stays in VMEM/vregs, never round-trips HBM."""
    x = x_ref[...]
    mean = jnp.mean(x, axis=-1, keepdims=True)
    var = jnp.mean(jnp.square(x - mean), axis=-1, keepdims=True)
    xn = (x - mean) * jax.lax.rsqrt(var + eps) * g_ref[...] + b_ref[...]
    xb = xn.astype(jnp.bfloat16)
    h = jnp.dot(xb, w1_ref[...], preferred_element_type=jnp.float32) + b1_ref[...]
    h = jax.nn.gelu(h, approximate=False)                 # nn.GELU() exact erf
    out = jnp.dot(h.astype(jnp.bfloat16), w2_ref[...],
                  preferred_element_type=jnp.float32) + b2_ref[...]
    out = out + jnp.dot(xb, pw_ref[...], preferred_element_type=jnp.float32) + pb_ref[...]
    o_ref[...] = out


def _ln_mlp_id_kernel(x_ref, g_ref, b_ref, w1_ref, b1_ref, w2_ref, b2_ref,
                      o_ref, *, eps):
    """Same as above but with identity residual (no channel projection)."""
    x = x_ref[...]
    mean = jnp.mean(x, axis=-1, keepdims=True)
    var = jnp.mean(jnp.square(x - mean), axis=-1, keepdims=True)
    xn = (x - mean) * jax.lax.rsqrt(var + eps) * g_ref[...] + b_ref[...]
    xb = xn.astype(jnp.bfloat16)
    h = jnp.dot(xb, w1_ref[...], preferred_element_type=jnp.float32) + b1_ref[...]
    h = jax.nn.gelu(h, approximate=False)
    out = jnp.dot(h.astype(jnp.bfloat16), w2_ref[...],
                  preferred_element_type=jnp.float32) + b2_ref[...]
    o_ref[...] = out + x


def _attn_proj_kernel(q_ref, k_ref, v_ref, skip_ref, pw_ref, pb_ref, o_ref,
                      *, scale, num_heads, head_dim):
    """One (batch, q-tile) grid step: per-head softmax(scale*q k^T) v + q
    (residual_pool), heads merged along lanes, then ONE head-merged output
    projection (contraction over C) plus bias and skip residual.
    q/k/v/skip/out all carry the lane-dense head-major (·, C) layout."""
    q = q_ref[...].astype(jnp.float32)                    # (tq, C)
    k = k_ref[...].astype(jnp.bfloat16)                   # (Nk, C)
    v = v_ref[...].astype(jnp.bfloat16)                   # (Nk, C)
    d = head_dim
    dn = (((1,), (1,)), ((), ()))                         # contract last dims (a @ b.T)
    outs = []
    for h in range(num_heads):                            # small, unrolled
        lo = h * d
        qh = q[:, lo:lo + d]
        kh = k[:, lo:lo + d]
        vh = v[:, lo:lo + d]
        s = jax.lax.dot_general((qh * scale).astype(jnp.bfloat16), kh, dn,
                                preferred_element_type=jnp.float32)   # (tq, Nk)
        s = s - jnp.max(s, axis=-1, keepdims=True)
        p = jnp.exp(s)
        # approx reciprocal: EUP slot, ~1e-3 rel err vs exact division
        p = p * pl.reciprocal(jnp.sum(p, axis=-1, keepdims=True), approx=True)
        oh = jnp.dot(p.astype(jnp.bfloat16), vh,
                     preferred_element_type=jnp.float32) + qh          # residual_pool
        outs.append(oh)
    o = jnp.concatenate(outs, axis=-1).astype(jnp.bfloat16)            # (tq, C) head-major
    o_ref[...] = (skip_ref[...] + pb_ref[...] +
                  jnp.dot(o, pw_ref[...], preferred_element_type=jnp.float32))


def _pool_conv_ln_kernel(vol_ref, cls_ref, w_ref, g_ref, b_ref,
                         body_ref, cls_out_ref, *, ksize, stride, out_sizes,
                         c, num_heads, eps):
    """Depthwise Conv3d (zero padded, strided) + per-head LayerNorm, ALL heads at
    once (channel axis = heads*head_dim, lane dense).  vol_ref is the phase-split
    padded volume (LT, LH, LW, S*C): every window tap is a contiguous static slice.
    The depthwise weight / LN affine arrive pre-tiled across heads."""
    kT, kH, kW = ksize
    sT, sH, sW = stride
    To, Ho, Wo = out_sizes
    d = c // num_heads
    g = g_ref[...]                                        # (1, C) head-tiled gamma
    b = b_ref[...]                                        # (1, C) head-tiled beta

    def seg_ln(x):                                        # per-head LN over channel segments
        parts = []
        for h in range(num_heads):
            xh = x[..., h * d:(h + 1) * d]
            m = jnp.mean(xh, axis=-1, keepdims=True)
            v = jnp.mean(jnp.square(xh - m), axis=-1, keepdims=True)
            parts.append((xh - m) * jax.lax.rsqrt(v + eps))
        return jnp.concatenate(parts, axis=-1) * g + b

    for to in range(To):                                  # To is small; unrolled
        acc = jnp.zeros((Ho, Wo, c), jnp.float32)
        for kt in range(kT):
            for kh in range(kH):
                for kw in range(kW):
                    ph = (kt % sT) * (sH * sW) + (kh % sH) * sW + (kw % sW)
                    slab = vol_ref[to + kt // sT,
                                   pl.ds(kh // sH, Ho),
                                   pl.ds(kw // sW, Wo),
                                   pl.ds(ph * c, c)]
                    ki = (kt * kH + kh) * kW + kw
                    acc = acc + slab.astype(jnp.float32) * w_ref[pl.ds(ki, 1), :]
        body_ref[to] = seg_ln(acc).astype(body_ref.dtype)
    # class token: not pooled, but the pool's per-head LayerNorm applies to it too
    cls_out_ref[...] = seg_ln(cls_ref[...].astype(jnp.float32)).astype(cls_out_ref.dtype)


def _pool_max_kernel(vol_ref, o_ref, *, ksize, stride, out_sizes, c):
    """MaxPool3d (-inf padded, strided) for one volume on the phase-split layout."""
    kT, kH, kW = ksize
    sT, sH, sW = stride
    To, Ho, Wo = out_sizes
    for to in range(To):
        acc = jnp.full((Ho, Wo, c), -jnp.inf, dtype=jnp.float32)
        for kt in range(kT):
            for kh in range(kH):
                for kw in range(kW):
                    ph = (kt % sT) * (sH * sW) + (kh % sH) * sW + (kw % sW)
                    slab = vol_ref[to + kt // sT,
                                   pl.ds(kh // sH, Ho),
                                   pl.ds(kw // sW, Wo),
                                   pl.ds(ph * c, c)]
                    acc = jnp.maximum(acc, slab)
        o_ref[to] = acc


# ============================== kernel wrappers ==============================

def pallas_ln_qkv(x2d, gamma, beta, w, bias, eps=LN_EPS, tile_m=512):
    """x2d (M, C) f32 -> q/k/v each (M, C) bf16 with head-major channel layout."""
    M, C = x2d.shape
    tm = min(tile_m, M)
    return pl.pallas_call(
        partial(_ln_qkv_kernel, eps=eps, c=C),
        out_shape=tuple(jax.ShapeDtypeStruct((M, C), jnp.bfloat16) for _ in range(3)),
        grid=(pl.cdiv(M, tm),),
        in_specs=[pl.BlockSpec((tm, C), lambda i: (i, 0)),
                  pl.BlockSpec((1, C), lambda i: (0, 0)),
                  pl.BlockSpec((1, C), lambda i: (0, 0)),
                  pl.BlockSpec((C, 3 * C), lambda i: (0, 0)),
                  pl.BlockSpec((1, 3 * C), lambda i: (0, 0))],
        out_specs=tuple(pl.BlockSpec((tm, C), lambda i: (i, 0)) for _ in range(3)),
        compiler_params=_mosaic_params("parallel"),
    )(x2d, gamma.reshape(1, C), beta.reshape(1, C), w, bias.reshape(1, 3 * C))


def pallas_ln_mlp(x2d, gamma, beta, proj_w, proj_b, w1, b1, w2, b2,
                  eps=LN_EPS, tile_m=256):
    M, C = x2d.shape
    Ch = w1.shape[1]
    C_out = w2.shape[1]
    tm = min(tile_m, M)
    x_spec = pl.BlockSpec((tm, C), lambda i: (i, 0))
    vec_c = pl.BlockSpec((1, C), lambda i: (0, 0))
    mlp_specs = [pl.BlockSpec((C, Ch), lambda i: (0, 0)),
                 pl.BlockSpec((1, Ch), lambda i: (0, 0)),
                 pl.BlockSpec((Ch, C_out), lambda i: (0, 0)),
                 pl.BlockSpec((1, C_out), lambda i: (0, 0))]
    if proj_w is not None:
        kern = partial(_ln_mlp_proj_kernel, eps=eps)
        in_specs = [x_spec, vec_c, vec_c,
                    pl.BlockSpec((C, C_out), lambda i: (0, 0)),
                    pl.BlockSpec((1, C_out), lambda i: (0, 0))] + mlp_specs
        args = (x2d, gamma.reshape(1, C), beta.reshape(1, C),
                proj_w, proj_b.reshape(1, C_out),
                w1, b1.reshape(1, Ch), w2, b2.reshape(1, C_out))
    else:
        kern = partial(_ln_mlp_id_kernel, eps=eps)
        in_specs = [x_spec, vec_c, vec_c] + mlp_specs
        args = (x2d, gamma.reshape(1, C), beta.reshape(1, C),
                w1, b1.reshape(1, Ch), w2, b2.reshape(1, C_out))
    return pl.pallas_call(
        kern,
        out_shape=jax.ShapeDtypeStruct((M, C_out), jnp.float32),
        grid=(pl.cdiv(M, tm),),
        in_specs=in_specs,
        out_specs=pl.BlockSpec((tm, C_out), lambda i: (i, 0)),
        compiler_params=_mosaic_params("parallel"),
    )(*args)


def pallas_attention_proj(q, k, v, skip, proj_w, proj_b, scale, heads, d,
                          tile_q=256):
    """q/skip (B, Nq, C), k/v (B, Nk, C); grid over (B, q-tiles)."""
    B, Nq, C = q.shape
    Nk = k.shape[1]
    tq = min(tile_q, Nq)
    return pl.pallas_call(
        partial(_attn_proj_kernel, scale=scale, num_heads=heads, head_dim=d),
        out_shape=jax.ShapeDtypeStruct((B, Nq, C), jnp.float32),
        grid=(B, pl.cdiv(Nq, tq)),
        in_specs=[pl.BlockSpec((None, tq, C), lambda b, i: (b, i, 0)),
                  pl.BlockSpec((None, Nk, C), lambda b, i: (b, 0, 0)),
                  pl.BlockSpec((None, Nk, C), lambda b, i: (b, 0, 0)),
                  pl.BlockSpec((None, tq, C), lambda b, i: (b, i, 0)),
                  pl.BlockSpec((C, C), lambda b, i: (0, 0)),
                  pl.BlockSpec((1, C), lambda b, i: (0, 0))],
        out_specs=pl.BlockSpec((None, tq, C), lambda b, i: (b, i, 0)),
        compiler_params=_mosaic_params("parallel", "parallel"),
    )(q, k, v, skip, proj_w, proj_b.reshape(1, C))


def pallas_pool_conv_ln(vd, cls, w_taps, gamma, beta, ksize, stride, out_sizes,
                        C, heads, out_dtype, eps=LN_EPS):
    Bn, LT, LH, LW, SC = vd.shape
    To, Ho, Wo = out_sizes
    K = w_taps.shape[0]
    return pl.pallas_call(
        partial(_pool_conv_ln_kernel, ksize=ksize, stride=stride,
                out_sizes=out_sizes, c=C, num_heads=heads, eps=eps),
        out_shape=(jax.ShapeDtypeStruct((Bn, To, Ho, Wo, C), out_dtype),
                   jax.ShapeDtypeStruct((Bn, 1, C), out_dtype)),
        grid=(Bn,),
        in_specs=[pl.BlockSpec((None, LT, LH, LW, SC), lambda b: (b, 0, 0, 0, 0)),
                  pl.BlockSpec((None, 1, C), lambda b: (b, 0, 0)),
                  pl.BlockSpec((K, C), lambda b: (0, 0)),
                  pl.BlockSpec((1, C), lambda b: (0, 0)),
                  pl.BlockSpec((1, C), lambda b: (0, 0))],
        out_specs=(pl.BlockSpec((None, To, Ho, Wo, C), lambda b: (b, 0, 0, 0, 0)),
                   pl.BlockSpec((None, 1, C), lambda b: (b, 0, 0))),
        compiler_params=_mosaic_params("parallel"),
    )(vd, cls, w_taps, gamma.reshape(1, C), beta.reshape(1, C))


def pallas_pool_max(vd, ksize, stride, out_sizes, C):
    Bn, LT, LH, LW, SC = vd.shape
    To, Ho, Wo = out_sizes
    return pl.pallas_call(
        partial(_pool_max_kernel, ksize=ksize, stride=stride, out_sizes=out_sizes, c=C),
        out_shape=jax.ShapeDtypeStruct((Bn, To, Ho, Wo, C), jnp.float32),
        grid=(Bn,),
        in_specs=[pl.BlockSpec((None, LT, LH, LW, SC), lambda b: (b, 0, 0, 0, 0))],
        out_specs=pl.BlockSpec((None, To, Ho, Wo, C), lambda b: (b, 0, 0, 0, 0)),
        compiler_params=_mosaic_params("parallel"),
    )(vd)


# ======================== glue (pure data movement) ========================

def _phase_decompose(vol, ksize, stride, pad_value):
    """(Bn, T, H, W, C) -> (Bn, LT, LH, LW, S*C) phase-split padded volume.

    value[b, l, m, n, (st*sH*sW + sh*sW + sw)*C + c] ==
        padded_vol[b, l*sT + st, m*sH + sh, n*sW + sw, c]
    so every strided window offset becomes a contiguous static slice in-kernel and
    HBM traffic stays ~1x the volume (no K-times patch tensor).
    # TODO(synk): could be folded into the pool kernels with strided pl.ds loads to
    # save this one XLA pad/transpose round trip."""
    Bn, T, H, W, C = vol.shape
    kT, kH, kW = ksize
    sT, sH, sW = stride
    pT, pH, pW = kT // 2, kH // 2, kW // 2

    def axis(a, k, s, p):
        out = (a + 2 * p - k) // s + 1
        L = max(-(-(a + 2 * p) // s), out + (k - 1) // s)
        return out, L, (p, L * s - a - p)

    To, LT, padT = axis(T, kT, sT, pT)
    Ho, LH, padH = axis(H, kH, sH, pH)
    Wo, LW, padW = axis(W, kW, sW, pW)
    vp = jnp.pad(vol, ((0, 0), padT, padH, padW, (0, 0)), constant_values=pad_value)
    vd = vp.reshape(Bn, LT, sT, LH, sH, LW, sW, C)
    vd = jnp.transpose(vd, (0, 1, 3, 5, 2, 4, 6, 7))
    vd = vd.reshape(Bn, LT, LH, LW, sT * sH * sW * C)
    return vd, (To, Ho, Wo)


def conv_pool(x_all, thw, w_taps, ln_g, ln_b, ksize, stride, heads, out_dtype):
    """Pool(Conv3d depthwise, per-head LayerNorm) on the lane-dense (B, N, C)
    head-major layout; all heads pooled in one kernel."""
    B, N, C = x_all.shape
    T, H, W = thw
    cls, body = x_all[:, :1, :], x_all[:, 1:, :]
    vol = body.reshape(B, T, H, W, C)
    vd, out_sizes = _phase_decompose(vol, ksize, stride, 0.0)
    body_p, cls_p = pallas_pool_conv_ln(vd, cls, w_taps, ln_g, ln_b,
                                        ksize, stride, out_sizes, C, heads, out_dtype)
    To, Ho, Wo = out_sizes
    body_p = body_p.reshape(B, To * Ho * Wo, C)
    return jnp.concatenate([cls_p, body_p], axis=1), out_sizes


def maxpool_skip(x, thw, stride):
    """Pool(MaxPool3d, norm=None) on (B, 1+L, C); class token passes through."""
    B, _, C = x.shape
    T, H, W = thw
    ksize = tuple(s + 1 if s > 1 else s for s in stride)
    cls, body = x[:, :1, :], x[:, 1:, :]
    vol = body.reshape(B, T, H, W, C)
    vd, out_sizes = _phase_decompose(vol, ksize, stride, -jnp.inf)
    To, Ho, Wo = out_sizes
    pooled = pallas_pool_max(vd, ksize, stride, out_sizes, C)
    pooled = pooled.reshape(B, To * Ho * Wo, C)
    return jnp.concatenate([cls, pooled], axis=1), out_sizes


def multiscale_block(x, thw, p, cfg):
    B, N, C = x.shape
    heads = cfg["num_heads"]
    d = C // heads
    scale = 1.0 / math.sqrt(d)
    kernel_q, stride_q = cfg["kernel_q"], cfg["stride_q"]
    kernel_kv, stride_kv = cfg["kernel_kv"], cfg["stride_kv"]

    # skip path (MaxPool3d when stride_q > 1)
    if math.prod(stride_q) > 1:
        x_skip, _ = maxpool_skip(x, thw, stride_q)
    else:
        x_skip = x

    # fused norm1 + qkv -> three lane-dense (B, N, C) bf16 tensors (head-major)
    q_all, k_all, v_all = pallas_ln_qkv(x.reshape(B * N, C), p["norm1_g"],
                                        p["norm1_b"], p["qkv_w"], p["qkv_b"])
    q_all = q_all.reshape(B, N, C)
    k_all = k_all.reshape(B, N, C)
    v_all = v_all.reshape(B, N, C)

    # conv pooling (+ per-head LayerNorm), all heads at once
    if p["pool_k_w"] is not None:
        k_all, _ = conv_pool(k_all, thw, p["pool_k_w"], p["pool_k_g"], p["pool_k_b"],
                             kernel_kv, stride_kv, heads, jnp.bfloat16)
        v_all, _ = conv_pool(v_all, thw, p["pool_v_w"], p["pool_v_g"], p["pool_v_b"],
                             kernel_kv, stride_kv, heads, jnp.bfloat16)
    if p["pool_q_w"] is not None:
        q_all, thw = conv_pool(q_all, thw, p["pool_q_w"], p["pool_q_g"], p["pool_q_b"],
                               kernel_q, stride_q, heads, jnp.float32)

    # attention core + residual_pool + head-merged output projection + skip residual
    # TODO(synk): dropout / stochastic depth with prob 0.0 are identities and omitted.
    x = pallas_attention_proj(q_all, k_all, v_all, x_skip, p["proj_w"], p["proj_b"],
                              scale, heads, d)            # (B, Nq, C) f32

    # fused norm2 + (optional channel projection) + MLP
    Nq = x.shape[1]
    out = pallas_ln_mlp(x.reshape(B * Nq, C), p["norm2_g"], p["norm2_b"],
                        p["project_w"], p["project_b"],
                        p["mlp_w1"], p["mlp_b1"], p["mlp_w2"], p["mlp_b2"])
    return out.reshape(B, Nq, -1), thw


# ========================== deterministic params ==========================

def init_params(key, C_in, C_out, num_heads, kernel_q, kernel_kv, pool_q, pool_kv):
    assert C_in % num_heads == 0
    d = C_in // num_heads
    ks = iter(jax.random.split(key, 32))
    bf = jnp.bfloat16

    def w(shape, s=0.02, dtype=jnp.float32):
        return (jax.random.normal(next(ks), shape, jnp.float32) * s).astype(dtype)

    p = {
        "norm1_g": 1.0 + w((C_in,), 0.01), "norm1_b": w((C_in,), 0.01),
        "norm2_g": 1.0 + w((C_in,), 0.01), "norm2_b": w((C_in,), 0.01),
        # matmul weights stored bf16 once (no per-call astype / HBM convert)
        "qkv_w": w((C_in, 3 * C_in), dtype=bf), "qkv_b": w((3 * C_in,)),
        "proj_w": w((C_in, C_in), dtype=bf), "proj_b": w((C_in,)),
        "mlp_w1": w((C_in, 4 * C_in), dtype=bf), "mlp_b1": w((4 * C_in,)),
        "mlp_w2": w((4 * C_in, C_out), dtype=bf), "mlp_b2": w((C_out,)),
    }
    if C_in != C_out:
        p["project_w"], p["project_b"] = w((C_in, C_out), dtype=bf), w((C_out,))
    else:
        p["project_w"], p["project_b"] = None, None

    def pool_entry(prefix, kernel, enabled):
        if not enabled:
            p[prefix + "_w"] = p[prefix + "_g"] = p[prefix + "_b"] = None
            return
        w_tap = w(tuple(kernel) + (d,))                   # depthwise weight (kT,kH,kW,d)
        # tile across heads -> lane-dense (K, C) taps / (C,) LN affine
        p[prefix + "_w"] = jnp.tile(w_tap.reshape(-1, d), (1, num_heads))
        p[prefix + "_g"] = jnp.tile(1.0 + w((d,), 0.01), num_heads)
        p[prefix + "_b"] = jnp.tile(w((d,), 0.01), num_heads)

    pool_entry("pool_q", kernel_q, pool_q)
    pool_entry("pool_k", kernel_kv, pool_kv)
    pool_entry("pool_v", kernel_kv, pool_kv)
    return p


# ================================== demo ==================================

if __name__ == "__main__":
    cfg = dict(num_heads=2,
               input_channels=64,
               output_channels=96,
               kernel_q=(3, 3, 3),
               kernel_kv=(3, 3, 3),
               stride_q=(1, 2, 2),
               stride_kv=(1, 2, 2))
    B, (T, H, W) = 2, (2, 8, 8)
    N = 1 + T * H * W                     # class token + T*H*W patches = 129

    key = jax.random.PRNGKey(0)
    kx, kp = jax.random.split(key)
    x = jax.random.normal(kx, (B, N, cfg["input_channels"]), jnp.float32)

    params = init_params(
        kp, cfg["input_channels"], cfg["output_channels"], cfg["num_heads"],
        cfg["kernel_q"], cfg["kernel_kv"],
        pool_q=math.prod(cfg["kernel_q"]) > 1 or math.prod(cfg["stride_q"]) > 1,
        pool_kv=math.prod(cfg["kernel_kv"]) > 1 or math.prod(cfg["stride_kv"]) > 1)

    out, thw_out = multiscale_block(x, (T, H, W), params, cfg)
    out = jax.block_until_ready(out)
    assert out.shape == (B, 1 + thw_out[0] * thw_out[1] * thw_out[2],
                         cfg["output_channels"])
    assert bool(jnp.all(jnp.isfinite(out)))
    print("KERNEL_OK")
</pallas_src>

<mosaic_0001>
module attributes {stable_mosaic.version = 11 : i64} {
  func.func @_pool_max_kernel(%arg0: i32, %arg1: memref<1x2x5x5x256xf32, #tpu.memory_space<vmem>>, %arg2: memref<1x2x4x4x64xf32, #tpu.memory_space<vmem>>) attributes {dimension_semantics = [#tpu.dimension_semantics<parallel>], iteration_bounds = array<i64: 2>, scalar_prefetch = 0 : i64, scratch_operands = 0 : i64, tpu.core_type = #tpu.core_type<tc>, window_params = [{transform_indices = @transform_0, window_bounds = array<i64: 1, 2, 5, 5, 256>}, {transform_indices = @transform_1, window_bounds = array<i64: 1, 2, 4, 4, 64>}]} {
    %cst = arith.constant 0xFF800000 : f32
    %0 = vector.broadcast %cst : f32 to vector<4x4x64xf32>
    %c0 = arith.constant 0 : index
    %c0_0 = arith.constant 0 : index
    %c0_1 = arith.constant 0 : index
    %c0_2 = arith.constant 0 : index
    %c0_3 = arith.constant 0 : index
    %1 = vector.load %arg1[%c0, %c0_0, %c0_1, %c0_2, %c0_3] : memref<1x2x5x5x256xf32, #tpu.memory_space<vmem>>, vector<1x1x4x4x64xf32>
    %2 = vector.shape_cast %1 : vector<1x1x4x4x64xf32> to vector<4x4x64xf32>
    %3 = arith.maximumf %0, %2 : vector<4x4x64xf32>
    %c0_4 = arith.constant 0 : index
    %c0_5 = arith.constant 0 : index
    %c0_6 = arith.constant 0 : index
    %c0_7 = arith.constant 0 : index
    %c64 = arith.constant 64 : index
    %4 = vector.load %arg1[%c0_4, %c0_5, %c0_6, %c0_7, %c64] : memref<1x2x5x5x256xf32, #tpu.memory_space<vmem>>, vector<1x1x4x4x64xf32>
    %5 = vector.shape_cast %4 : vector<1x1x4x4x64xf32> to vector<4x4x64xf32>
    %6 = arith.maximumf %3, %5 : vector<4x4x64xf32>
    %c0_8 = arith.constant 0 : index
    %c0_9 = arith.constant 0 : index
    %c0_10 = arith.constant 0 : index
    %c1 = arith.constant 1 : index
    %c0_11 = arith.constant 0 : index
    %7 = vector.load %arg1[%c0_8, %c0_9, %c0_10, %c1, %c0_11] : memref<1x2x5x5x256xf32, #tpu.memory_space<vmem>>, vector<1x1x4x4x64xf32>
    %8 = vector.shape_cast %7 : vector<1x1x4x4x64xf32> to vector<4x4x64xf32>
    %9 = arith.maximumf %6, %8 : vector<4x4x64xf32>
    %c0_12 = arith.constant 0 : index
    %c0_13 = arith.constant 0 : index
    %c0_14 = arith.constant 0 : index
    %c0_15 = arith.constant 0 : index
    %c128 = arith.constant 128 : index
    %10 = vector.load %arg1[%c0_12, %c0_13, %c0_14, %c0_15, %c128] : memref<1x2x5x5x256xf32, #tpu.memory_space<vmem>>, vector<1x1x4x4x64xf32>
    %11 = vector.shape_cast %10 : vector<1x1x4x4x64xf32> to vector<4x4x64xf32>
    %12 = arith.maximumf %9, %11 : vector<4x4x64xf32>
    %c0_16 = arith.constant 0 : index
    %c0_17 = arith.constant 0 : index
    %c0_18 = arith.constant 0 : index
    %c0_19 = arith.constant 0 : index
    %c192 = arith.constant 192 : index
    %13 = vector.load %arg1[%c0_16, %c0_17, %c0_18, %c0_19, %c192] : memref<1x2x5x5x256xf32, #tpu.memory_space<vmem>>, vector<1x1x4x4x64xf32>
    %14 = vector.shape_cast %13 : vector<1x1x4x4x64xf32> to vector<4x4x64xf32>
    %15 = arith.maximumf %12, %14 : vector<4x4x64xf32>
    %c0_20 = arith.constant 0 : index
    %c0_21 = arith.constant 0 : index
    %c0_22 = arith.constant 0 : index
    %c1_23 = arith.constant 1 : index
    %c128_24 = arith.constant 128 : index
    %16 = vector.load %arg1[%c0_20, %c0_21, %c0_22, %c1_23, %c128_24] : memref<1x2x5x5x256xf32, #tpu.memory_space<vmem>>, vector<1x1x4x4x64xf32>
    %17 = vector.shape_cast %16 : vector<1x1x4x4x64xf32> to vector<4x4x64xf32>
    %18 = arith.maximumf %15, %17 : vector<4x4x64xf32>
    %c0_25 = arith.constant 0 : index
    %c0_26 = arith.constant 0 : index
    %c1_27 = arith.constant 1 : index
    %c0_28 = arith.constant 0 : index
    %c0_29 = arith.constant 0 : index
    %19 = vector.load %arg1[%c0_25, %c0_26, %c1_27, %c0_28, %c0_29] : memref<1x2x5x5x256xf32, #tpu.memory_space<vmem>>, vector<1x1x4x4x64xf32>
    %20 = vector.shape_cast %19 : vector<1x1x4x4x64xf32> to vector<4x4x64xf32>
    %21 = arith.maximumf %18, %20 : vector<4x4x64xf32>
    %c0_30 = arith.constant 0 : index
    %c0_31 = arith.constant 0 : index
    %c1_32 = arith.constant 1 : index
    %c0_33 = arith.constant 0 : index
    %c64_34 = arith.constant 64 : index
    %22 = vector.load %arg1[%c0_30, %c0_31, %c1_32, %c0_33, %c64_34] : memref<1x2x5x5x256xf32, #tpu.memory_space<vmem>>, vector<1x1x4x4x64xf32>
    %23 = vector.shape_cast %22 : vector<1x1x4x4x64xf32> to vector<4x4x64xf32>
    %24 = arith.maximumf %21, %23 : vector<4x4x64xf32>
    %c0_35 = arith.constant 0 : index
    %c0_36 = arith.constant 0 : index
    %c1_37 = arith.constant 1 : index
    %c1_38 = arith.constant 1 : index
    %c0_39 = arith.constant 0 : index
    %25 = vector.load %arg1[%c0_35, %c0_36, %c1_37, %c1_38, %c0_39] : memref<1x2x5x5x256xf32, #tpu.memory_space<vmem>>, vector<1x1x4x4x64xf32>
    %26 = vector.shape_cast %25 : vector<1x1x4x4x64xf32> to vector<4x4x64xf32>
    %27 = arith.maximumf %24, %26 : vector<4x4x64xf32>
    %c0_40 = arith.constant 0 : index
    %c0_41 = arith.constant 0 : index
    %c0_42 = arith.constant 0 : index
    %c0_43 = arith.constant 0 : index
    %c0_44 = arith.constant 0 : index
    %28 = vector.load %arg2[%c0_40, %c0_41, %c0_42, %c0_43, %c0_44] : memref<1x2x4x4x64xf32, #tpu.memory_space<vmem>>, vector<1x1x4x4x64xf32>
    %29 = vector.shape_cast %28 : vector<1x1x4x4x64xf32> to vector<4x4x64xf32>
    %30 = vector.shape_cast %27 : vector<4x4x64xf32> to vector<1x1x4x4x64xf32>
    tpu.vector_store %arg2[%c0_40, %c0_41, %c0_42, %c0_43, %c0_44], %30 {strides = array<i32>} : memref<1x2x4x4x64xf32, #tpu.memory_space<vmem>>, vector<1x1x4x4x64xf32>,
    %cst_45 = arith.constant 0xFF800000 : f32
    %31 = vector.broadcast %cst_45 : f32 to vector<4x4x64xf32>
    %c0_46 = arith.constant 0 : index
    %c1_47 = arith.constant 1 : index
    %c0_48 = arith.constant 0 : index
    %c0_49 = arith.constant 0 : index
    %c0_50 = arith.constant 0 : index
    %32 = vector.load %arg1[%c0_46, %c1_47, %c0_48, %c0_49, %c0_50] : memref<1x2x5x5x256xf32, #tpu.memory_space<vmem>>, vector<1x1x4x4x64xf32>
    %33 = vector.shape_cast %32 : vector<1x1x4x4x64xf32> to vector<4x4x64xf32>
    %34 = arith.maximumf %31, %33 : vector<4x4x64xf32>
    %c0_51 = arith.constant 0 : index
    %c1_52 = arith.constant 1 : index
    %c0_53 = arith.constant 0 : index
    %c0_54 = arith.constant 0 : index
    %c64_55 = arith.constant 64 : index
    %35 = vector.load %arg1[%c0_51, %c1_52, %c0_53, %c0_54, %c64_55] : memref<1x2x5x5x256xf32, #tpu.memory_space<vmem>>, vector<1x1x4x4x64xf32>
    %36 = vector.shape_cast %35 : vector<1x1x4x4x64xf32> to vector<4x4x64xf32>
    %37 = arith.maximumf %34, %36 : vector<4x4x64xf32>
    %c0_56 = arith.constant 0 : index
    %c1_57 = arith.constant 1 : index
    %c0_58 = arith.constant 0 : index
    %c1_59 = arith.constant 1 : index
    %c0_60 = arith.constant 0 : index
    %38 = vector.load %arg1[%c0_56, %c1_57, %c0_58, %c1_59, %c0_60] : memref<1x2x5x5x256xf32, #tpu.memory_space<vmem>>, vector<1x1x4x4x64xf32>
    %39 = vector.shape_cast %38 : vector<1x1x4x4x64xf32> to vector<4x4x64xf32>
    %40 = arith.maximumf %37, %39 : vector<4x4x64xf32>
    %c0_61 = arith.constant 0 : index
    %c1_62 = arith.constant 1 : index
    %c0_63 = arith.constant 0 : index
    %c0_64 = arith.constant 0 : index
    %c128_65 = arith.constant 128 : index
    %41 = vector.load %arg1[%c0_61, %c1_62, %c0_63, %c0_64, %c128_65] : memref<1x2x5x5x256xf32, #tpu.memory_space<vmem>>, vector<1x1x4x4x64xf32>
    %42 = vector.shape_cast %41 : vector<1x1x4x4x64xf32> to vector<4x4x64xf32>
    %43 = arith.maximumf %40, %42 : vector<4x4x64xf32>
    %c0_66 = arith.constant 0 : index
    %c1_67 = arith.constant 1 : index
    %c0_68 = arith.constant 0 : index
    %c0_69 = arith.constant 0 : index
    %c192_70 = arith.constant 192 : index
    %44 = vector.load %arg1[%c0_66, %c1_67, %c0_68, %c0_69, %c192_70] : memref<1x2x5x5x256xf32, #tpu.memory_space<vmem>>, vector<1x1x4x4x64xf32>
    %45 = vector.shape_cast %44 : vector<1x1x4x4x64xf32> to vector<4x4x64xf32>
    %46 = arith.maximumf %43, %45 : vector<4x4x64xf32>
    %c0_71 = arith.constant 0 : index
    %c1_72 = arith.constant 1 : index
    %c0_73 = arith.constant 0 : index
    %c1_74 = arith.constant 1 : index
    %c128_75 = arith.constant 128 : index
    %47 = vector.load %arg1[%c0_71, %c1_72, %c0_73, %c1_74, %c128_75] : memref<1x2x5x5x256xf32, #tpu.memory_space<vmem>>, vector<1x1x4x4x64xf32>
    %48 = vector.shape_cast %47 : vector<1x1x4x4x64xf32> to vector<4x4x64xf32>
    %49 = arith.maximumf %46, %48 : vector<4x4x64xf32>
    %c0_76 = arith.constant 0 : index
    %c1_77 = arith.constant 1 : index
    %c1_78 = arith.constant 1 : index
    %c0_79 = arith.constant 0 : index
    %c0_80 = arith.constant 0 : index
    %50 = vector.load %arg1[%c0_76, %c1_77, %c1_78, %c0_79, %c0_80] : memref<1x2x5x5x256xf32, #tpu.memory_space<vmem>>, vector<1x1x4x4x64xf32>
    %51 = vector.shape_cast %50 : vector<1x1x4x4x64xf32> to vector<4x4x64xf32>
    %52 = arith.maximumf %49, %51 : vector<4x4x64xf32>
    %c0_81 = arith.constant 0 : index
    %c1_82 = arith.constant 1 : index
    %c1_83 = arith.constant 1 : index
    %c0_84 = arith.constant 0 : index
    %c64_85 = arith.constant 64 : index
    %53 = vector.load %arg1[%c0_81, %c1_82, %c1_83, %c0_84, %c64_85] : memref<1x2x5x5x256xf32, #tpu.memory_space<vmem>>, vector<1x1x4x4x64xf32>
    %54 = vector.shape_cast %53 : vector<1x1x4x4x64xf32> to vector<4x4x64xf32>
    %55 = arith.maximumf %52, %54 : vector<4x4x64xf32>
    %c0_86 = arith.constant 0 : index
    %c1_87 = arith.constant 1 : index
    %c1_88 = arith.constant 1 : index
    %c1_89 = arith.constant 1 : index
    %c0_90 = arith.constant 0 : index
    %56 = vector.load %arg1[%c0_86, %c1_87, %c1_88, %c1_89, %c0_90] : memref<1x2x5x5x256xf32, #tpu.memory_space<vmem>>, vector<1x1x4x4x64xf32>
    %57 = vector.shape_cast %56 : vector<1x1x4x4x64xf32> to vector<4x4x64xf32>
    %58 = arith.maximumf %55, %57 : vector<4x4x64xf32>
    %c0_91 = arith.constant 0 : index
    %c1_92 = arith.constant 1 : index
    %c0_93 = arith.constant 0 : index
    %c0_94 = arith.constant 0 : index
    %c0_95 = arith.constant 0 : index
    %59 = vector.load %arg2[%c0_91, %c1_92, %c0_93, %c0_94, %c0_95] : memref<1x2x4x4x64xf32, #tpu.memory_space<vmem>>, vector<1x1x4x4x64xf32>
    %60 = vector.shape_cast %59 : vector<1x1x4x4x64xf32> to vector<4x4x64xf32>
    %61 = vector.shape_cast %58 : vector<4x4x64xf32> to vector<1x1x4x4x64xf32>
    tpu.vector_store %arg2[%c0_91, %c1_92, %c0_93, %c0_94, %c0_95], %61 {strides = array<i32>} : memref<1x2x4x4x64xf32, #tpu.memory_space<vmem>>, vector<1x1x4x4x64xf32>,
    return
  }
  func.func @transform_0(%arg0: i32) -> (i32, i32, i32, i32, i32) {
    %c0_i32 = arith.constant 0 : i32
    %c0_i32_0 = arith.constant 0 : i32
    %c0_i32_1 = arith.constant 0 : i32
    %c0_i32_2 = arith.constant 0 : i32
    %c0_i32_3 = arith.constant 0 : i32
    return %arg0, %c0_i32, %c0_i32_0, %c0_i32_1, %c0_i32_2 : i32, i32, i32, i32, i32
  }
  func.func @transform_1(%arg0: i32) -> (i32, i32, i32, i32, i32) {
    %c0_i32 = arith.constant 0 : i32
    %c0_i32_0 = arith.constant 0 : i32
    %c0_i32_1 = arith.constant 0 : i32
    %c0_i32_2 = arith.constant 0 : i32
    %c0_i32_3 = arith.constant 0 : i32
    return %arg0, %c0_i32, %c0_i32_0, %c0_i32_1, %c0_i32_2 : i32, i32, i32, i32, i32
  }
}

</mosaic_0001>

<bundles_post_ra>
// kernel: tpu_custom_call.1
= control target key start
LH: loop header
LB: loop body
LE: loop exit
PB: predicated region body
PF: predicated region fallthrough
CT: control target
= control target key end

     0   :  { %6 = vsyncpa [#allocation3], 0  ;;  %s932_s0 = inlined_call_operand.vmem [shape: f32[2,2,5,5,256], index: 0, kind: input, shape index: {}]   ;;  %s933_s1 = inlined_call_operand.hbm [shape: f32[2,2,4,4,64], index: 1, kind: output, shape index: {}]  }
   0x1   :  { %8 = vsyncpa [#allocation3 + $0x1], 0  ;;  %s652_s6 = smov 0   ;;  %s654_s7 = smov 0  }
   0x2   :  { %s656_s8 = smov 0   ;;  %s658_s9 = smov 0  }
   0x3 LB: > { %s673_s10 = sadd.s32 4294967295, %s638_s9   ;;  %s486_s11 = sadd.s32 4294967294, %s638_s9   ;;  %s638_s9 = sphi %s658_s9, %s939_s9   ;;  %s634_s8 = sphi %s656_s8, %s938_s8   ;;  %s630_s7 = sphi %s654_s7, %s937_s7   ;;  %s626_s6 = sphi %s652_s6, %s936_s6  }
   0x4   : > { %s677_s12 = sadd.s32 1, %s638_s9   ;;  %s47_s13 = sadd.s32 1, %s634_s8 }
   0x5   : > { %s44_s14 = ssub.s32 %s638_s9, %s677_s12  ;;  %p57_p0 = scmp.ne.s32.totalorder %s634_s8, %s630_s7 }
   0x6   : > { %p45_p1 = scmp.eq.s32.totalorder %s44_s14, 0  ;;  %p58_p2 = scmp.eq.s32.totalorder %s673_s10, 1 }
   0x7   : > { %p63_p3 = scmp.ne.s32.totalorder %s630_s7, %s626_s6  ;;  %p64_p4 = scmp.eq.s32.totalorder %s486_s11, 1 }
   0x8   : > { %s688_s15 = scalar_select %p45_p1, %s634_s8, %s47_s13  }
   0x9   : > { %p690_p5 = por %p58_p2, %p57_p0  ;;  %p694_p6 = por %p64_p4, %p63_p3 }
   0xa   : > { %p489_p7 = scmp.ge.s32.totalorder %s638_s9, 1  ;;  %p90_p8 = scmp.lt.s32.totalorder %s638_s9, 3 }
   0xc   : > { %p91_p9 = pnand %p489_p7, %p90_p8 }
   0xd   : > { %p110_p10 = scmp.lt.s32.totalorder (!%p91_p9), %s673_s10, 1  ;;  %s640_s23 = smov (!%p91_p9), 64  }
   0xe   : > { %94 = sbr.rel (%p91_p9) target bundleno = 205 (0xcd), region = 24  ;;  %s107_s24 = sand.u32 (!%p91_p9), 1, %s630_s7  }
   0xf   : > { %s490_s25 = sshll.u32 (!%p91_p9), %s107_s24, 5  ;;  %s533_s27 = sshll.u32 (!%p91_p9), %s673_s10, 5 }
  0x10   : > { %s837_s26 = scalar_lea.vmem (!%p91_p9), [#allocation2], %s490_s25  ;;  %s420_s30 = scalar_lea.hbm (!%p91_p9), %s933_s1, %s533_s27 }
  0x11   : > { %s421_s2 = sshll.u32 (!%p91_p9), %s837_s26, 4  ;;  %s423_s3 = sshll.u32 (!%p91_p9), %s420_s30, 4  ;;  %s422_s2 = int_to_ptr.vmem [resolvable:$true] %s421_s2  ;;  %s424_s3 = int_to_ptr.hbm [resolvable:$true] %s423_s3 }
  0x12   : > { %s409_s4 = scalar_lea.sflag (!%p91_p9), [#allocation3], %s107_s24  ;;  %s590_s5 = sshra.s32 (!%p91_p9), %s424_s3, 4  ;;  %s591_s5 = int_to_ptr.hbm [resolvable:$true] %s590_s5 }
  0x13   : > { %s111_s18 = scalar_select %p110_p10, %s673_s10, 1  ;;  %vm256_vm0 = vcmask 519168  }
  0x14   : > { %s592_s10 = scalar_lea.hbm %s591_s5, 32  ;;  %s596_s14 = scalar_lea.hbm %s933_s1, 64 }
  0x15   : > { %s534_s19 = smul.u32 160, %s111_s18  ;;  %p593_p11 = scmp.ne.s32.totalorder %s591_s5, %s592_s10 }
  0x16   : > { %p597_p0 = scmp.lt.s32.totalorder %s591_s5, %s933_s1  ;;  %p598_p1 = scmp.lt.s32.totalorder %s596_s14, %s592_s10 }
  0x17   : > { %s705_s22 = scalar_lea.vmem %s932_s0, %s534_s19  ;;  %p594_p12 = pnand %p593_p11, %p690_p5 }
  0x18   : > { %v708_v0 = vld [vmem:[%s705_s22 + $0x20] sm:$0xf]  ;;  %v714_v2 = vld [vmem:[%s705_s22 + $0x8] sm:$0xf]  ;;  %v723_v3 = vld [vmem:[%s705_s22 + $0x30] sm:$0xf]  ;;  %p599_p2 = por %p598_p1, %p597_p0 }
  0x19   : > { %v711_v1 = vld [vmem:[%s705_s22] sm:$0xf]  ;;  %127 = vrot.lane.b32.xlu1 %v708_v0, %s640_s23  ;;  %171 = vrot.lane.b32.xlu2 %v714_v2, %s640_s23  ;;  %v116_v4 = vld [vmem:[%s705_s22 + $0x10] sm:$0xf]  ;;  %p595_p13 = pneg %p594_p12 }
  0x1a   : > { %123 = vrot.lane.b32.xlu0 %v711_v1, %s640_s23  ;;  %v160_v5 = vld [vmem:[%s705_s22 + $0x18] sm:$0xf]  ;;  %v732_v6 = vld [vmem:[%s705_s22 + $0x60] sm:$0xf]  ;;  %v735_v7 = vld [vmem:[%s705_s22 + $0x50] sm:$0xf] }
  0x1b   : > { %v738_v8 = vld [vmem:[%s705_s22 + $0x70] sm:$0xf]  ;;  %v747_v9 = vld [vmem:[%s705_s22 + $0x28] sm:$0xf]  ;;  %v750_v10 = vld [vmem:[%s705_s22 + $0x80] sm:$0xf]  ;;  %p600_p3 = pnand %p599_p2, %p595_p13 }
  0x1c   : > { %v753_v11 = vld [vmem:[%s705_s22 + $0x38] sm:$0xf]  ;;  %v762_v12 = vld [vmem:[%s705_s22 + $0x68] sm:$0xf]  ;;  %v777_v15 = vld [vmem:[%s705_s22 + $0x10] sm:$0xf] }
  0x1d   : > { %v765_v13 = vld [vmem:[%s705_s22 + $0x58] sm:$0xf]  ;;  %v780_v16 = vld [vmem:[%s705_s22 + $0x88] sm:$0xf]  ;;  %v493_v17 = vld [vmem:[%s705_s22 + $0x20] sm:$0xf] }
  0x1e   : > { %v768_v14 = vld [vmem:[%s705_s22 + $0x78] sm:$0xf]  ;;  %v789_v18 = vld [vmem:[%s705_s22 + $0x40] sm:$0xf]  ;;  %v792_v19 = vld [vmem:[%s705_s22 + $0x30] sm:$0xf] }
  0x1f   : > { %v795_v20 = vld [vmem:[%s705_s22 + $0x60] sm:$0xf]  ;;  %v807_v22 = vld [vmem:[%s705_s22 + $0x70] sm:$0xf]  ;;  %v188_v36 = vld [vmem:[%s705_s22 + $0x18] sm:$0x1e] }
  0x20   : > { %v804_v21 = vld [vmem:[%s705_s22 + $0x80] sm:$0xf]  ;;  %v810_v23 = vld [vmem:[%s705_s22 + $0x90] sm:$0xf]  ;;  %v196_v39 = vrot.slane %v188_v36, 1 }
  0x21   : > { %129 = vrot.lane.b32.xlu1 %v723_v3, %s640_s23  ;;  %173 = vrot.lane.b32.xlu2 %v160_v5, %s640_s23  ;;  %v140_v30 = vld [vmem:[%s705_s22 + $0x10] sm:$0x1e]  ;;  %v139_v40 = vld [vmem:[%s705_s22] sm:$0x1e] }
  0x22   : > { %125 = vrot.lane.b32.xlu0 %v116_v4, %s640_s23  ;;  %v148_v31 = vrot.slane %v140_v30, 1  ;;  %v497_v44 = vld [vmem:[%s705_s22 + $0x20] sm:$0x1e]  ;;  %v147_v46 = vrot.slane %v139_v40, 1  ;;  %v504_v51 = vld [vmem:[%s705_s22 + $0x50] sm:$0x1e] }
  0x23   : > { %v245_v49 = vrot.slane %v497_v44, 1  ;;  %v294_v54 = vrot.slane %v504_v51, 1  ;;  %v142_v57 = vld [vmem:[%s705_s22 + $0x30] sm:$0x1e]  ;;  %v141_v60 = vld [vmem:[%s705_s22 + $0x20] sm:$0x1e] }
  0x24   : > { %v150_v62 = vrot.slane %v142_v57, 1  ;;  %v189_v40 = vld [vmem:[%s705_s22 + $0x28] sm:$0x1e] }
  0x29   : > { %272 = vrot.lane.b32.xlu1 %v732_v6, %s640_s23  ;;  %274 = vrot.lane.b32.xlu2 %v738_v8, %s640_s23 }
  0x2a   : > { %270 = vrot.lane.b32.xlu0 %v735_v7, %s640_s23 }
  0x31   : > { %175 = vrot.lane.b32.xlu1 %v747_v9, %s640_s23  ;;  %177 = vrot.lane.b32.xlu2 %v753_v11, %s640_s23 }
  0x32   : > { %276 = vrot.lane.b32.xlu0 %v750_v10, %s640_s23 }
  0x39   : > { %320 = vrot.lane.b32.xlu1 %v762_v12, %s640_s23  ;;  %322 = vrot.lane.b32.xlu2 %v768_v14, %s640_s23 }
  0x3a   : > { %318 = vrot.lane.b32.xlu0 %v765_v13, %s640_s23 }
  0x41   : > { %220 = vrot.lane.b32.xlu1 %v777_v15, %s640_s23  ;;  %222 = vrot.lane.b32.xlu2 %v493_v17, %s640_s23 }
  0x42   : > { %324 = vrot.lane.b32.xlu0 %v780_v16, %s640_s23 }
  0x49   : > { %226 = vrot.lane.b32.xlu1 %v789_v18, %s640_s23  ;;  %367 = vrot.lane.b32.xlu2 %v795_v20, %s640_s23 }
  0x4a   : > { %224 = vrot.lane.b32.xlu0 %v792_v19, %s640_s23 }
  0x51   : > { %371 = vrot.lane.b32.xlu1 %v804_v21, %s640_s23  ;;  %373 = vrot.lane.b32.xlu2 %v810_v23, %s640_s23 }
  0x52   : > { %369 = vrot.lane.b32.xlu0 %v807_v22, %s640_s23 }
  0x73   : > { %v172_v24 = vpop.permute.xlu2 %171 }
  0x7b   : > { %v174_v25 = vpop.permute.xlu2 %173 }
  0x83   : > { %v818_v26 = vpop.permute.xlu2 %274 }
  0x8b   : > { %v128_v27 = vpop.permute.xlu1 %127  ;;  %v820_v29 = vpop.permute.xlu2 %177 }
  0x8c   : > { %v124_v28 = vpop.permute.xlu0 %123 }
  0x8d   : > { %v135_v47 = vmax.f32 %v711_v1, %v124_v28 }
  0x8f   : > { %v155_v53 = vmax.f32 %v135_v47, %v147_v46  ;;  %v496_v47 = vld [vmem:[%s705_s22 + $0x10] sm:$0x1e] }
  0x91   : > { %v163_v61 = vmax.f32 %v155_v53, %v714_v2 }
  0x93   : > { %v130_v32 = vpop.permute.xlu1 %129  ;;  %v823_v35 = vpop.permute.xlu2 %322 }
  0x94   : > { %v126_v33 = vpop.permute.xlu0 %125  ;;  %v138_v63 = vmax.f32 %v723_v3, %v130_v32 }
  0x95   : > { %v136_v34 = vmax.f32 %v116_v4, %v126_v33  ;;  %v507_v4 = vld [vmem:[%s705_s22 + $0x80] sm:$0x1e]  ;;  %v506_v33 = vld [vmem:[%s705_s22 + $0x70] sm:$0x1e] }
  0x96   : > { %v297_v28 = vrot.slane %v507_v4, 1  ;;  %v513_v4 = vld [vmem:[%s705_s22 + $0x68] sm:$0x1e] }
  0x97   : > { %v156_v37 = vmax.f32 %v136_v34, %v148_v31  ;;  %v183_v31 = vmax.f32 %v163_v61, %v172_v24  ;;  %v158_v34 = vmax.f32 %v138_v63, %v150_v62  ;;  %v284_v24 = vmax.f32 %v738_v8, %v818_v26 }
  0x99   : > { %v164_v38 = vmax.f32 %v156_v37, %v160_v5  ;;  %v187_v5 = vld [vmem:[%s705_s22 + $0x8] sm:$0x1e] }
  0x9a   : > { %v195_v30 = vrot.slane %v187_v5, 1  ;;  %v523_v5 = vld [vmem:[%s705_s22 + $0x90] sm:$0x1e] }
  0x9b   : > { %v184_v41 = vmax.f32 %v164_v38, %v174_v25  ;;  %v827_v42 = vpop.permute.xlu1 %272  ;;  %v223_v48 = vpop.permute.xlu2 %222  ;;  %v137_v25 = vmax.f32 %v708_v0, %v128_v27  ;;  %v190_v0 = vld [vmem:[%s705_s22 + $0x38] sm:$0x1e]  ;;  %v296_v27 = vrot.slane %v506_v33, 1  ;;  %v394_v33 = vrot.slane %v523_v5, 1 }
  0x9c   : > { %v271_v43 = vpop.permute.xlu0 %270  ;;  %v198_v51 = vrot.slane %v190_v0, 1 }
  0x9d   : > { %v204_v45 = vmax.f32 %v184_v41, %v196_v39  ;;  %v282_v55 = vmax.f32 %v735_v7, %v271_v43  ;;  %v512_v7 = vld [vmem:[%s705_s22 + $0x58] sm:$0x1e]  ;;  %v505_v39 = vld [vmem:[%s705_s22 + $0x60] sm:$0x1e]  ;;  %v304_v26 = vmax.f32 %v284_v24, %v296_v27 }
  0x9e   : > { %v342_v32 = vrot.slane %v512_v7, 1  ;;  %v520_v43 = vld [vmem:[%s705_s22 + $0x60] sm:$0x1e] }
  0x9f   : > { %v213_v50 = vmax.f32 %v204_v45, %v493_v17  ;;  %v302_v1 = vmax.f32 %v282_v55, %v294_v54  ;;  %v149_v17 = vrot.slane %v141_v60, 1  ;;  %v203_v45 = vmax.f32 %v183_v31, %v195_v30 }
  0xa0   : > { %v391_v54 = vrot.slane %v520_v43, 1  ;;  %v244_v55 = vrot.slane %v496_v47, 1 }
  0xa1   : > { %v233_v52 = vmax.f32 %v213_v50, %v223_v48  ;;  %v310_v3 = vmax.f32 %v302_v1, %v765_v13  ;;  %v157_v38 = vmax.f32 %v137_v25, %v149_v17  ;;  %v515_v48 = vld [vmem:[%s705_s22 + $0x88] sm:$0x1e]  ;;  %v197_v50 = vrot.slane %v189_v40, 1  ;;  %v499_v17 = vld [vmem:[%s705_s22 + $0x40] sm:$0x1e] }
  0xa2   : > { %v312_v1 = vmax.f32 %v304_v26, %v768_v14  ;;  %v498_v25 = vld [vmem:[%s705_s22 + $0x30] sm:$0x1e] }
  0xa3   : > { %v253_v56 = vmax.f32 %v233_v52, %v245_v49  ;;  %v176_v58 = vpop.permute.xlu1 %175  ;;  %v368_v44 = vpop.permute.xlu2 %367  ;;  %v295_v49 = vrot.slane %v505_v39, 1  ;;  %v283_v52 = vmax.f32 %v732_v6, %v827_v42  ;;  %v165_v53 = vmax.f32 %v157_v38, %v747_v9 }
  0xa4   : > { %v277_v59 = vpop.permute.xlu0 %276 }
  0xa5   : > { %258 = vst.msk [vmem:[%s837_s26 + $0x4] sm:$0xf] %vm256_vm0, %v253_v56  ;;  %v285_v2 = vmax.f32 %v750_v10, %v277_v59  ;;  %v166_v10 = vmax.f32 %v158_v34, %v753_v11  ;;  %v212_v11 = vmax.f32 %v203_v45, %v777_v15  ;;  %v345_v56 = vrot.slane %v515_v48, 1  ;;  %v514_v15 = vld [vmem:[%s705_s22 + $0x78] sm:$0x1e] }
  0xa6   : > { %v185_v57 = vmax.f32 %v165_v53, %v176_v58  ;;  %v344_v30 = vrot.slane %v514_v15, 1  ;;  %v332_v34 = vmax.f32 %v312_v1, %v823_v35  ;;  %v521_v45 = vld [vmem:[%s705_s22 + $0x70] sm:$0x1e] }
  0xa7   : > { %v305_v13 = vmax.f32 %v285_v2, %v297_v28  ;;  %v186_v6 = vmax.f32 %v166_v10, %v820_v29  ;;  %v343_v2 = vrot.slane %v513_v4, 1 }
  0xa8   : > { %v205_v58 = vmax.f32 %v185_v57, %v197_v50  ;;  %v352_v35 = vmax.f32 %v332_v34, %v344_v30 }
  0xa9   : > { %v313_v60 = vmax.f32 %v305_v13, %v780_v16  ;;  %v206_v29 = vmax.f32 %v186_v6, %v198_v51  ;;  %v392_v13 = vrot.slane %v521_v45, 1 }
  0xab   : > { %v321_v36 = vpop.permute.xlu1 %320  ;;  %v374_v28 = vpop.permute.xlu2 %373  ;;  %v215_v39 = vmax.f32 %v206_v29, %v789_v18  ;;  %v361_v18 = vmax.f32 %v352_v35, %v804_v21 }
  0xac   : > { %v319_v37 = vpop.permute.xlu0 %318 }
  0xad   : > { %v330_v41 = vmax.f32 %v310_v3, %v319_v37  ;;  %v247_v3 = vrot.slane %v499_v17, 1 }
  0xaf   : > { %v350_v46 = vmax.f32 %v330_v41, %v342_v32  ;;  %v246_v32 = vrot.slane %v498_v25, 1 }
  0xb1   : > { %v359_v8 = vmax.f32 %v350_v46, %v795_v20  ;;  %v303_v20 = vmax.f32 %v283_v52, %v295_v49 }
  0xb3   : > { %v379_v59 = vmax.f32 %v359_v8, %v368_v44  ;;  %v221_v9 = vpop.permute.xlu1 %220  ;;  %v311_v31 = vmax.f32 %v303_v20, %v762_v12  ;;  %v214_v12 = vmax.f32 %v205_v58, %v792_v19  ;;  %v522_v44 = vld [vmem:[%s705_s22 + $0x80] sm:$0x1e] }
  0xb4   : > { %v325_v42 = vpop.permute.xlu0 %324  ;;  %v232_v62 = vmax.f32 %v212_v11, %v221_v9  ;;  %v393_v19 = vrot.slane %v522_v44, 1 }
  0xb5   : > { %v399_v61 = vmax.f32 %v379_v59, %v391_v54  ;;  %v333_v63 = vmax.f32 %v313_v60, %v325_v42  ;;  %v331_v37 = vmax.f32 %v311_v31, %v321_v36 }
  0xb6   : > { %v252_v16 = vmax.f32 %v232_v62, %v244_v55 }
  0xb7   : > { %524 = vst.msk [vmem:[%s837_s26 + $0x10] sm:$0xf] %vm256_vm0, %v399_v61  ;;  %v353_v7 = vmax.f32 %v333_v63, %v345_v56  ;;  %v351_v24 = vmax.f32 %v331_v37, %v343_v2 }
  0xb8   : > { %257 = vst.msk [vmem:[%s837_s26] sm:$0xf] %vm256_vm0, %v252_v16 }
  0xb9   : > { %v362_v14 = vmax.f32 %v353_v7, %v810_v23  ;;  %v360_v10 = vmax.f32 %v351_v24, %v807_v22 }
  0xbb   : > { %v382_v38 = vmax.f32 %v362_v14, %v374_v28  ;;  %v227_v40 = vpop.permute.xlu1 %226 }
  0xbc   : > { %v225_v41 = vpop.permute.xlu0 %224  ;;  %v235_v0 = vmax.f32 %v215_v39, %v227_v40 }
  0xbd   : > { %v402_v23 = vmax.f32 %v382_v38, %v394_v33  ;;  %v234_v27 = vmax.f32 %v214_v12, %v225_v41 }
  0xbe   : > { %v255_v43 = vmax.f32 %v235_v0, %v247_v3 }
  0xbf   : > { %527 = vst.msk [vmem:[%s837_s26 + $0x1c] sm:$0xf] %vm256_vm0, %v402_v23  ;;  %v254_v36 = vmax.f32 %v234_v27, %v246_v32 }
  0xc0   : > { %260 = vst.msk [vmem:[%s837_s26 + $0xc] sm:$0xf] %vm256_vm0, %v255_v43 }
  0xc1   : > { %259 = vst.msk [vmem:[%s837_s26 + $0x8] sm:$0xf] %vm256_vm0, %v254_v36 }
  0xc3   : > { %v372_v46 = vpop.permute.xlu1 %371 }
  0xc4   : > { %v370_v47 = vpop.permute.xlu0 %369  ;;  %v381_v48 = vmax.f32 %v361_v18, %v372_v46 }
  0xc5   : > { %v380_v49 = vmax.f32 %v360_v10, %v370_v47 }
  0xc6   : > { %v401_v50 = vmax.f32 %v381_v48, %v393_v19 }
  0xc7   : > { %v400_v51 = vmax.f32 %v380_v49, %v392_v13 }
  0xc8   : > { %526 = vst.msk [vmem:[%s837_s26 + $0x18] sm:$0xf] %vm256_vm0, %v401_v50 }
  0xc9   : > { %525 = vst.msk [vmem:[%s837_s26 + $0x14] sm:$0xf] %vm256_vm0, %v400_v51 }
  0xca   : > { %603 = shalt.err (!%p600_p3)
}
  0xcb   : > { %s641_s20 = smov 4  }
  0xcc   : > { %535 = dma.vmem_to_hbm [thread:$0]  (%p690_p5), %s422_s2, 512, %s424_s3, %s409_s4, %s640_s23, %s640_s23, %s641_s20  }
  0xcd PF: > { %p541_p4 = scmp.ge.s32.totalorder %s638_s9, 2  ;;  %s438_s21 = sand.u32 1, %s626_s6  }
  0xce   : > { %s439_s22 = scalar_lea.sflag [#allocation3], %s438_s21 }
  0xcf   : > { %p538_p7 = pnand %p541_p4, %p694_p6 }
  0xd1   : > { %p539_p8 = pneg %p538_p7 }
  0xd3   : > { %621 = dma.done.wait (%p539_p8), %s439_s22, 512  }
  0xd4   : > { %623 = vsyncadd (%p539_p8), %s439_s22, 4294966784  ;;  %p11_p9 = scmp.ge.s32.totalorder %s677_s12, 4   ;;  %s936_s6 = smov %s630_s7 }
  0xd5   : > { %s937_s7 = smov %s634_s8  ;;  %s938_s8 = smov %s688_s15 }
  0xd6   : > { %s939_s9 = smov %s677_s12  ;;  %13 = sbr.rel (!%p11_p9) target bundleno = 3 (0x3), region = 63 }
  0xdb   :  { %445 = vsyncpa [#allocation3], 1 }
  0xdc   :  { %447 = vsyncpa [#allocation3 + $0x1], 1 }

</bundles_post_ra>
